<compile_context>
chip_gen: v6e
topology: v6e:2x2x1
jax: 0.10.0
libtpu: 0.0.40
codegen_flags: <defaults>
</compile_context>

<pallas_src>
import jax
import jax.numpy as jnp
from jax.experimental import pallas as pl
from jax.experimental.pallas import tpu as pltpu

# ---- model hyper-parameters (small, consistent with the module) -------------
INPUT_DIM = 16
N_D = 32
N_A = 32
NDA = N_D + N_A
N_STEPS = 3
GAMMA = 1.3
BATCH = 8
HALF = N_D // 2
LANES = 128            # TPU lane width; feature axes padded to this

# ---- packed-parameter layout: one (TOTAL_ROWS, LANES) f32 buffer ------------
# per-step band (all weight-row offsets are multiples of 8):
AW1_OFF = 0                       # (LANES, N_A)  attentive Linear1 (BN folded); rows>=INPUT_DIM zero
AW2_OFF = AW1_OFF + LANES         # (N_A, LANES)  attentive Linear2; cols>=INPUT_DIM zero
FW1_OFF = AW2_OFF + N_A           # (LANES, NDA)  feature Linear1 (BN folded); rows>=INPUT_DIM zero
FW2_OFF = FW1_OFF + LANES         # (NDA, NDA)    feature Linear2 (BN folded)
BIA_OFF = FW2_OFF + NDA           # 4 bias rows: ab1, ab2, fb1, fb2
STEP_ROWS = ((BIA_OFF + 4 + 7) // 8) * 8
# head band:
HEAD_OFF = N_STEPS * STEP_ROWS
LW1_OFF = HEAD_OFF                # (NDA, HALF)   head Linear1 (BN folded); rows>=N_D zero (drops n_a half)
LW2_OFF = LW1_OFF + NDA           # (HALF, LANES) head Linear2; cols>=1 zero (lane-dense output slab)
LB_OFF = LW2_OFF + HALF           # 2 bias rows: lb1, lb2
TOTAL_ROWS = ((LB_OFF + 2 + 7) // 8) * 8


# ---- Pallas kernel: entire TabNet forward on one core ----------------------
def tabnet_kernel(x_ref, p_ref, out_ref, mloss_ref):
    x = x_ref[...]                                    # (BATCH, LANES); cols >= INPUT_DIM are zero
    prior = jnp.ones_like(x)
    agg_h = jnp.zeros((BATCH, NDA), jnp.float32)
    absdiff_acc = jnp.zeros((BATCH, LANES), jnp.float32)

    # Hoisted constants: rolling the lane index with the SAME roll used on M gives
    # a mask that selects exactly the INPUT_DIM-1 adjacent column pairs regardless
    # of the rotate direction convention.
    lane = jax.lax.broadcasted_iota(jnp.int32, (BATCH, LANES), 1)
    lane_r = pltpu.roll(lane, shift=1, axis=1)
    pair_mask = ((lane < INPUT_DIM) & (lane_r < INPUT_DIM)).astype(jnp.float32)

    # n_steps is tiny & static -> unrolled Python loop; per-step weights are carved
    # out of the packed buffer with static offsets.
    for s in range(N_STEPS):
        base = s * STEP_ROWS
        aw1 = p_ref[base + AW1_OFF: base + AW1_OFF + LANES, 0:N_A]
        aw2 = p_ref[base + AW2_OFF: base + AW2_OFF + N_A, :]
        fw1 = p_ref[base + FW1_OFF: base + FW1_OFF + LANES, 0:NDA]
        fw2 = p_ref[base + FW2_OFF: base + FW2_OFF + NDA, 0:NDA]
        ab1 = p_ref[base + BIA_OFF + 0: base + BIA_OFF + 1, 0:N_A]
        ab2 = p_ref[base + BIA_OFF + 1: base + BIA_OFF + 2, :]
        fb1 = p_ref[base + BIA_OFF + 2: base + BIA_OFF + 3, 0:NDA]
        fb2 = p_ref[base + BIA_OFF + 3: base + BIA_OFF + 4, 0:NDA]

        px = prior * x

        # attentive transformer: Linear(+folded BN) -> ReLU -> Linear -> Sigmoid
        a = jnp.maximum(
            jnp.dot(px, aw1, preferred_element_type=jnp.float32) + ab1, 0.0)
        m_logits = jnp.dot(a, aw2, preferred_element_type=jnp.float32) + ab2
        M = jax.nn.sigmoid(m_logits)                  # cols >= INPUT_DIM are 0.5 (masked below / x==0)

        # deferred sparsity loss: accumulate |adjacent-column diffs| via XLU roll
        absdiff_acc = absdiff_acc + jnp.abs(pltpu.roll(M, shift=1, axis=1) - M)

        # feature transformer: (Linear(+folded BN) -> ReLU) x 2
        masked_x = M * x
        h = jnp.maximum(
            jnp.dot(masked_x, fw1, preferred_element_type=jnp.float32) + fb1, 0.0)
        h = jnp.maximum(
            jnp.dot(h, fw2, preferred_element_type=jnp.float32) + fb2, 0.0)

        agg_h = agg_h + h                             # h >= 0 already; n_a half dropped by zero rows of lw1
        prior = (GAMMA - M) * prior

    # final head: Linear(+folded BN) -> ReLU -> Linear -> Sigmoid (lane-dense 128-wide output)
    lw1 = p_ref[LW1_OFF: LW1_OFF + NDA, 0:HALF]
    lw2 = p_ref[LW2_OFF: LW2_OFF + HALF, :]
    lb1 = p_ref[LB_OFF + 0: LB_OFF + 1, 0:HALF]
    lb2 = p_ref[LB_OFF + 1: LB_OFF + 2, :]
    z = jnp.maximum(
        jnp.dot(agg_h, lw1, preferred_element_type=jnp.float32) + lb1, 0.0)
    logits = jnp.dot(z, lw2, preferred_element_type=jnp.float32) + lb2
    out_ref[...] = jax.nn.sigmoid(logits)

    # single deferred reduction for M_loss (kept 2-D; (1,1) writeback)
    masked = absdiff_acc * pair_mask
    per_row = jnp.sum(masked, axis=1, keepdims=True)          # (BATCH, 1)
    mloss_ref[...] = jnp.sum(per_row, axis=0, keepdims=True) * (1.0 / BATCH)


# ---- wrapper ----------------------------------------------------------------
@jax.jit
def tabnet_forward(x, packed):
    # lane-dense input slab (zero-padded features)
    x_pad = jnp.zeros((x.shape[0], LANES), jnp.float32).at[:, :INPUT_DIM].set(x)
    vmem = pl.BlockSpec(memory_space=pltpu.MemorySpace.VMEM)
    out, mloss = pl.pallas_call(
        tabnet_kernel,
        out_shape=(jax.ShapeDtypeStruct((x.shape[0], LANES), jnp.float32),
                   jax.ShapeDtypeStruct((1, 1), jnp.float32)),
        in_specs=[vmem, vmem],
        out_specs=(vmem, vmem),
    )(x_pad, packed)
    return out[:, :1], mloss[0, 0]


# ---- deterministic parameter construction (PyTorch-style init) --------------
def make_params(key):
    keys = iter(jax.random.split(key, 128))

    def linear(fan_in, fan_out):
        bound = 1.0 / (fan_in ** 0.5)
        w = jax.random.uniform(next(keys), (fan_in, fan_out), jnp.float32, -bound, bound)
        b = jax.random.uniform(next(keys), (1, fan_out), jnp.float32, -bound, bound)
        return w, b

    def bn_affine(feat, eps=1e-5):
        # eval-mode BatchNorm expressed as per-feature scale/shift (synthetic running stats)
        weight = 1.0 + 0.05 * jax.random.normal(next(keys), (feat,), jnp.float32)
        bias = 0.05 * jax.random.normal(next(keys), (feat,), jnp.float32)
        mean = 0.1 * jax.random.normal(next(keys), (feat,), jnp.float32)
        var = 1.0 + jnp.abs(0.1 * jax.random.normal(next(keys), (feat,), jnp.float32))
        scale = weight / jnp.sqrt(var + eps)
        shift = bias - mean * scale
        return scale[None, :], shift[None, :]

    steps = []
    for _ in range(N_STEPS):
        p = {}
        p["aw1"], p["ab1"] = linear(INPUT_DIM, N_A)
        p["abn_s"], p["abn_b"] = bn_affine(N_A)
        p["aw2"], p["ab2"] = linear(N_A, INPUT_DIM)
        p["fw1"], p["fb1"] = linear(INPUT_DIM, NDA)
        p["fbn1_s"], p["fbn1_b"] = bn_affine(NDA)
        p["fw2"], p["fb2"] = linear(NDA, NDA)
        p["fbn2_s"], p["fbn2_b"] = bn_affine(NDA)
        steps.append(p)

    head = {}
    head["lw1"], head["lb1"] = linear(N_D, HALF)
    head["lbn_s"], head["lbn_b"] = bn_affine(HALF)
    head["lw2"], head["lb2"] = linear(HALF, 1)
    return steps, head


def pack_params(steps, head):
    """Fold eval-mode BN into the preceding Linear and pack everything into one
    lane-padded (TOTAL_ROWS, 128) f32 buffer -> a single HBM->VMEM DMA."""
    def fold(w, b, scale, shift):
        return w * scale, b * scale + shift

    buf = jnp.zeros((TOTAL_ROWS, LANES), jnp.float32)
    for s, p in enumerate(steps):
        base = s * STEP_ROWS
        aw1, ab1 = fold(p["aw1"], p["ab1"], p["abn_s"], p["abn_b"])
        fw1, fb1 = fold(p["fw1"], p["fb1"], p["fbn1_s"], p["fbn1_b"])
        fw2, fb2 = fold(p["fw2"], p["fb2"], p["fbn2_s"], p["fbn2_b"])
        buf = buf.at[base + AW1_OFF: base + AW1_OFF + INPUT_DIM, 0:N_A].set(aw1)
        buf = buf.at[base + AW2_OFF: base + AW2_OFF + N_A, 0:INPUT_DIM].set(p["aw2"])
        buf = buf.at[base + FW1_OFF: base + FW1_OFF + INPUT_DIM, 0:NDA].set(fw1)
        buf = buf.at[base + FW2_OFF: base + FW2_OFF + NDA, 0:NDA].set(fw2)
        buf = buf.at[base + BIA_OFF + 0, 0:N_A].set(ab1[0])
        buf = buf.at[base + BIA_OFF + 1, 0:INPUT_DIM].set(p["ab2"][0])
        buf = buf.at[base + BIA_OFF + 2, 0:NDA].set(fb1[0])
        buf = buf.at[base + BIA_OFF + 3, 0:NDA].set(fb2[0])

    lw1, lb1 = fold(head["lw1"], head["lb1"], head["lbn_s"], head["lbn_b"])
    buf = buf.at[LW1_OFF: LW1_OFF + N_D, 0:HALF].set(lw1)        # rows N_D:NDA stay zero
    buf = buf.at[LW2_OFF: LW2_OFF + HALF, 0:1].set(head["lw2"])  # cols 1: stay zero
    buf = buf.at[LB_OFF + 0, 0:HALF].set(lb1[0])
    buf = buf.at[LB_OFF + 1, 0:1].set(head["lb2"][0])
    return buf


# ---- pure-JAX reference (original eval-mode formulation, unfolded params) ----
def tabnet_reference(x, steps, head):
    prior = jnp.ones_like(x)
    m_loss = jnp.float32(0.0)
    agg_d = jnp.zeros((x.shape[0], N_D), jnp.float32)
    for p in steps:
        a = ((prior * x) @ p["aw1"] + p["ab1"]) * p["abn_s"] + p["abn_b"]
        a = jnp.maximum(a, 0.0)
        M = jax.nn.sigmoid(a @ p["aw2"] + p["ab2"])
        m_loss = m_loss + jnp.mean(jnp.sum(jnp.abs(M[:, 1:] - M[:, :-1]), axis=1))
        h = ((M * x) @ p["fw1"] + p["fb1"]) * p["fbn1_s"] + p["fbn1_b"]
        h = jnp.maximum(h, 0.0)
        h = (h @ p["fw2"] + p["fb2"]) * p["fbn2_s"] + p["fbn2_b"]
        h = jnp.maximum(h, 0.0)
        agg_d = agg_d + jnp.maximum(h[:, :N_D], 0.0)
        prior = (GAMMA - M) * prior
    z = (agg_d @ head["lw1"] + head["lb1"]) * head["lbn_s"] + head["lbn_b"]
    z = jnp.maximum(z, 0.0)
    return jax.nn.sigmoid(z @ head["lw2"] + head["lb2"]), m_loss


if __name__ == "__main__":
    key = jax.random.PRNGKey(0)
    kx, kp = jax.random.split(key)
    x = jax.random.normal(kx, (BATCH, INPUT_DIM), jnp.float32)
    steps, head = make_params(kp)
    packed = pack_params(steps, head)

    out, m_loss = tabnet_forward(x, packed)
    out = jax.block_until_ready(out)
    m_loss = jax.block_until_ready(m_loss)

    ref_out, ref_loss = tabnet_reference(x, steps, head)
    assert out.shape == (BATCH, 1)
    assert jnp.allclose(out, ref_out, atol=1e-5, rtol=1e-5), "output mismatch"
    assert jnp.allclose(m_loss, ref_loss, atol=1e-5, rtol=1e-5), "M_loss mismatch"

    print("KERNEL_OK")
</pallas_src>

<mosaic_0001>
module attributes {stable_mosaic.version = 11 : i64} {
  func.func @tabnet_kernel(%arg0: memref<8x128xf32, #tpu.memory_space<vmem>>, %arg1: memref<1168x128xf32, #tpu.memory_space<vmem>>, %arg2: memref<8x128xf32, #tpu.memory_space<vmem>>, %arg3: memref<1x1xf32, #tpu.memory_space<vmem>>) attributes {dimension_semantics = [], scalar_prefetch = 0 : i64, scratch_operands = 0 : i64, tpu.core_type = #tpu.core_type<tc>} {
    %c0 = arith.constant 0 : index
    %c0_0 = arith.constant 0 : index
    %0 = vector.load %arg0[%c0, %c0_0] : memref<8x128xf32, #tpu.memory_space<vmem>>, vector<8x128xf32>
    %cst = arith.constant 1.000000e+00 : f32
    %1 = vector.broadcast %cst : f32 to vector<8x128xf32>
    %cst_1 = arith.constant 0.000000e+00 : f32
    %2 = vector.broadcast %cst_1 : f32 to vector<8x64xf32>
    %cst_2 = arith.constant 0.000000e+00 : f32
    %3 = vector.broadcast %cst_2 : f32 to vector<8x128xf32>
    %4 = tpu.iota {dimensions = array<i32: 1>} : vector<8x128xi32>
    %c1_i32 = arith.constant 1 : i32
    %5 = tpu.dynamic_rotate %4 by %c1_i32 dim 1 : vector<8x128xi32>, i32 -> vector<8x128xi32>
    %c16_i32 = arith.constant 16 : i32
    %6 = vector.broadcast %c16_i32 : i32 to vector<8x128xi32>
    %7 = arith.cmpi slt, %4, %6 : vector<8x128xi32>
    %c16_i32_3 = arith.constant 16 : i32
    %8 = vector.broadcast %c16_i32_3 : i32 to vector<8x128xi32>
    %9 = arith.cmpi slt, %5, %8 : vector<8x128xi32>
    %10 = arith.andi %7, %9 : vector<8x128xi1>
    %11 = arith.extui %10 : vector<8x128xi1> to vector<8x128xi32>
    %12 = arith.sitofp %11 : vector<8x128xi32> to vector<8x128xf32>
    %c0_4 = arith.constant 0 : index
    %c0_5 = arith.constant 0 : index
    %13 = vector.load %arg1[%c0_4, %c0_5] : memref<1168x128xf32, #tpu.memory_space<vmem>>, vector<128x32xf32>
    %c128 = arith.constant 128 : index
    %c0_6 = arith.constant 0 : index
    %14 = vector.load %arg1[%c128, %c0_6] : memref<1168x128xf32, #tpu.memory_space<vmem>>, vector<32x128xf32>
    %c160 = arith.constant 160 : index
    %c0_7 = arith.constant 0 : index
    %15 = vector.load %arg1[%c160, %c0_7] : memref<1168x128xf32, #tpu.memory_space<vmem>>, vector<128x64xf32>
    %c288 = arith.constant 288 : index
    %c0_8 = arith.constant 0 : index
    %16 = vector.load %arg1[%c288, %c0_8] : memref<1168x128xf32, #tpu.memory_space<vmem>>, vector<64x64xf32>
    %c352 = arith.constant 352 : index
    %c0_9 = arith.constant 0 : index
    %17 = vector.load %arg1[%c352, %c0_9] : memref<1168x128xf32, #tpu.memory_space<vmem>>, vector<1x32xf32>
    %c353 = arith.constant 353 : index
    %c0_10 = arith.constant 0 : index
    %18 = vector.load %arg1[%c353, %c0_10] : memref<1168x128xf32, #tpu.memory_space<vmem>>, vector<1x128xf32>
    %c354 = arith.constant 354 : index
    %c0_11 = arith.constant 0 : index
    %19 = vector.load %arg1[%c354, %c0_11] : memref<1168x128xf32, #tpu.memory_space<vmem>>, vector<1x64xf32>
    %c355 = arith.constant 355 : index
    %c0_12 = arith.constant 0 : index
    %20 = vector.load %arg1[%c355, %c0_12] : memref<1168x128xf32, #tpu.memory_space<vmem>>, vector<1x64xf32>
    %21 = arith.mulf %1, %0 : vector<8x128xf32>
    %cst_13 = arith.constant dense<0.000000e+00> : vector<8x32xf32>
    %22 = tpu.matmul %21, %13, %cst_13 {dimension_numbers = #tpu.dot_dimension_numbers<[1], [0], [0], [1], [0, 0, 1, 1], [], []>} : vector<8x128xf32>, vector<128x32xf32>, vector<8x32xf32> -> vector<8x32xf32>
    %23 = vector.broadcast %17 : vector<1x32xf32> to vector<8x32xf32>
    %24 = arith.addf %22, %23 : vector<8x32xf32>
    %cst_14 = arith.constant 0.000000e+00 : f32
    %25 = vector.broadcast %cst_14 : f32 to vector<8x32xf32>
    %26 = arith.maximumf %24, %25 : vector<8x32xf32>
    %cst_15 = arith.constant dense<0.000000e+00> : vector<8x128xf32>
    %27 = tpu.matmul %26, %14, %cst_15 {dimension_numbers = #tpu.dot_dimension_numbers<[1], [0], [0], [1], [0, 0, 1, 1], [], []>} : vector<8x32xf32>, vector<32x128xf32>, vector<8x128xf32> -> vector<8x128xf32>
    %28 = vector.broadcast %18 : vector<1x128xf32> to vector<8x128xf32>
    %29 = arith.addf %27, %28 : vector<8x128xf32>
    %30 = arith.negf %29 : vector<8x128xf32>
    %31 = math.exp %30 : vector<8x128xf32>
    %cst_16 = arith.constant 1.000000e+00 : f32
    %32 = vector.broadcast %cst_16 : f32 to vector<8x128xf32>
    %33 = arith.addf %32, %31 : vector<8x128xf32>
    %34 = arith.divf %32, %33 : vector<8x128xf32>
    %c1_i32_17 = arith.constant 1 : i32
    %35 = tpu.dynamic_rotate %34 by %c1_i32_17 dim 1 : vector<8x128xf32>, i32 -> vector<8x128xf32>
    %36 = arith.subf %35, %34 : vector<8x128xf32>
    %37 = math.absf %36 : vector<8x128xf32>
    %38 = arith.addf %3, %37 : vector<8x128xf32>
    %39 = arith.mulf %34, %0 : vector<8x128xf32>
    %cst_18 = arith.constant dense<0.000000e+00> : vector<8x64xf32>
    %40 = tpu.matmul %39, %15, %cst_18 {dimension_numbers = #tpu.dot_dimension_numbers<[1], [0], [0], [1], [0, 0, 1, 1], [], []>} : vector<8x128xf32>, vector<128x64xf32>, vector<8x64xf32> -> vector<8x64xf32>
    %41 = vector.broadcast %19 : vector<1x64xf32> to vector<8x64xf32>
    %42 = arith.addf %40, %41 : vector<8x64xf32>
    %cst_19 = arith.constant 0.000000e+00 : f32
    %43 = vector.broadcast %cst_19 : f32 to vector<8x64xf32>
    %44 = arith.maximumf %42, %43 : vector<8x64xf32>
    %cst_20 = arith.constant dense<0.000000e+00> : vector<8x64xf32>
    %45 = tpu.matmul %44, %16, %cst_20 {dimension_numbers = #tpu.dot_dimension_numbers<[1], [0], [0], [1], [0, 0, 1, 1], [], []>} : vector<8x64xf32>, vector<64x64xf32>, vector<8x64xf32> -> vector<8x64xf32>
    %46 = vector.broadcast %20 : vector<1x64xf32> to vector<8x64xf32>
    %47 = arith.addf %45, %46 : vector<8x64xf32>
    %cst_21 = arith.constant 0.000000e+00 : f32
    %48 = vector.broadcast %cst_21 : f32 to vector<8x64xf32>
    %49 = arith.maximumf %47, %48 : vector<8x64xf32>
    %50 = arith.addf %2, %49 : vector<8x64xf32>
    %cst_22 = arith.constant 1.300000e+00 : f32
    %51 = vector.broadcast %cst_22 : f32 to vector<8x128xf32>
    %52 = arith.subf %51, %34 : vector<8x128xf32>
    %53 = arith.mulf %52, %1 : vector<8x128xf32>
    %c360 = arith.constant 360 : index
    %c0_23 = arith.constant 0 : index
    %54 = vector.load %arg1[%c360, %c0_23] : memref<1168x128xf32, #tpu.memory_space<vmem>>, vector<128x32xf32>
    %c488 = arith.constant 488 : index
    %c0_24 = arith.constant 0 : index
    %55 = vector.load %arg1[%c488, %c0_24] : memref<1168x128xf32, #tpu.memory_space<vmem>>, vector<32x128xf32>
    %c520 = arith.constant 520 : index
    %c0_25 = arith.constant 0 : index
    %56 = vector.load %arg1[%c520, %c0_25] : memref<1168x128xf32, #tpu.memory_space<vmem>>, vector<128x64xf32>
    %c648 = arith.constant 648 : index
    %c0_26 = arith.constant 0 : index
    %57 = vector.load %arg1[%c648, %c0_26] : memref<1168x128xf32, #tpu.memory_space<vmem>>, vector<64x64xf32>
    %c712 = arith.constant 712 : index
    %c0_27 = arith.constant 0 : index
    %58 = vector.load %arg1[%c712, %c0_27] : memref<1168x128xf32, #tpu.memory_space<vmem>>, vector<1x32xf32>
    %c713 = arith.constant 713 : index
    %c0_28 = arith.constant 0 : index
    %59 = vector.load %arg1[%c713, %c0_28] : memref<1168x128xf32, #tpu.memory_space<vmem>>, vector<1x128xf32>
    %c714 = arith.constant 714 : index
    %c0_29 = arith.constant 0 : index
    %60 = vector.load %arg1[%c714, %c0_29] : memref<1168x128xf32, #tpu.memory_space<vmem>>, vector<1x64xf32>
    %c715 = arith.constant 715 : index
    %c0_30 = arith.constant 0 : index
    %61 = vector.load %arg1[%c715, %c0_30] : memref<1168x128xf32, #tpu.memory_space<vmem>>, vector<1x64xf32>
    %62 = arith.mulf %53, %0 : vector<8x128xf32>
    %cst_31 = arith.constant dense<0.000000e+00> : vector<8x32xf32>
    %63 = tpu.matmul %62, %54, %cst_31 {dimension_numbers = #tpu.dot_dimension_numbers<[1], [0], [0], [1], [0, 0, 1, 1], [], []>} : vector<8x128xf32>, vector<128x32xf32>, vector<8x32xf32> -> vector<8x32xf32>
    %64 = vector.broadcast %58 : vector<1x32xf32> to vector<8x32xf32>
    %65 = arith.addf %63, %64 : vector<8x32xf32>
    %cst_32 = arith.constant 0.000000e+00 : f32
    %66 = vector.broadcast %cst_32 : f32 to vector<8x32xf32>
    %67 = arith.maximumf %65, %66 : vector<8x32xf32>
    %cst_33 = arith.constant dense<0.000000e+00> : vector<8x128xf32>
    %68 = tpu.matmul %67, %55, %cst_33 {dimension_numbers = #tpu.dot_dimension_numbers<[1], [0], [0], [1], [0, 0, 1, 1], [], []>} : vector<8x32xf32>, vector<32x128xf32>, vector<8x128xf32> -> vector<8x128xf32>
    %69 = vector.broadcast %59 : vector<1x128xf32> to vector<8x128xf32>
    %70 = arith.addf %68, %69 : vector<8x128xf32>
    %71 = arith.negf %70 : vector<8x128xf32>
    %72 = math.exp %71 : vector<8x128xf32>
    %cst_34 = arith.constant 1.000000e+00 : f32
    %73 = vector.broadcast %cst_34 : f32 to vector<8x128xf32>
    %74 = arith.addf %73, %72 : vector<8x128xf32>
    %75 = arith.divf %73, %74 : vector<8x128xf32>
    %c1_i32_35 = arith.constant 1 : i32
    %76 = tpu.dynamic_rotate %75 by %c1_i32_35 dim 1 : vector<8x128xf32>, i32 -> vector<8x128xf32>
    %77 = arith.subf %76, %75 : vector<8x128xf32>
    %78 = math.absf %77 : vector<8x128xf32>
    %79 = arith.addf %38, %78 : vector<8x128xf32>
    %80 = arith.mulf %75, %0 : vector<8x128xf32>
    %cst_36 = arith.constant dense<0.000000e+00> : vector<8x64xf32>
    %81 = tpu.matmul %80, %56, %cst_36 {dimension_numbers = #tpu.dot_dimension_numbers<[1], [0], [0], [1], [0, 0, 1, 1], [], []>} : vector<8x128xf32>, vector<128x64xf32>, vector<8x64xf32> -> vector<8x64xf32>
    %82 = vector.broadcast %60 : vector<1x64xf32> to vector<8x64xf32>
    %83 = arith.addf %81, %82 : vector<8x64xf32>
    %cst_37 = arith.constant 0.000000e+00 : f32
    %84 = vector.broadcast %cst_37 : f32 to vector<8x64xf32>
    %85 = arith.maximumf %83, %84 : vector<8x64xf32>
    %cst_38 = arith.constant dense<0.000000e+00> : vector<8x64xf32>
    %86 = tpu.matmul %85, %57, %cst_38 {dimension_numbers = #tpu.dot_dimension_numbers<[1], [0], [0], [1], [0, 0, 1, 1], [], []>} : vector<8x64xf32>, vector<64x64xf32>, vector<8x64xf32> -> vector<8x64xf32>
    %87 = vector.broadcast %61 : vector<1x64xf32> to vector<8x64xf32>
    %88 = arith.addf %86, %87 : vector<8x64xf32>
    %cst_39 = arith.constant 0.000000e+00 : f32
    %89 = vector.broadcast %cst_39 : f32 to vector<8x64xf32>
    %90 = arith.maximumf %88, %89 : vector<8x64xf32>
    %91 = arith.addf %50, %90 : vector<8x64xf32>
    %cst_40 = arith.constant 1.300000e+00 : f32
    %92 = vector.broadcast %cst_40 : f32 to vector<8x128xf32>
    %93 = arith.subf %92, %75 : vector<8x128xf32>
    %94 = arith.mulf %93, %53 : vector<8x128xf32>
    %c720 = arith.constant 720 : index
    %c0_41 = arith.constant 0 : index
    %95 = vector.load %arg1[%c720, %c0_41] : memref<1168x128xf32, #tpu.memory_space<vmem>>, vector<128x32xf32>
    %c848 = arith.constant 848 : index
    %c0_42 = arith.constant 0 : index
    %96 = vector.load %arg1[%c848, %c0_42] : memref<1168x128xf32, #tpu.memory_space<vmem>>, vector<32x128xf32>
    %c880 = arith.constant 880 : index
    %c0_43 = arith.constant 0 : index
    %97 = vector.load %arg1[%c880, %c0_43] : memref<1168x128xf32, #tpu.memory_space<vmem>>, vector<128x64xf32>
    %c1008 = arith.constant 1008 : index
    %c0_44 = arith.constant 0 : index
    %98 = vector.load %arg1[%c1008, %c0_44] : memref<1168x128xf32, #tpu.memory_space<vmem>>, vector<64x64xf32>
    %c1072 = arith.constant 1072 : index
    %c0_45 = arith.constant 0 : index
    %99 = vector.load %arg1[%c1072, %c0_45] : memref<1168x128xf32, #tpu.memory_space<vmem>>, vector<1x32xf32>
    %c1073 = arith.constant 1073 : index
    %c0_46 = arith.constant 0 : index
    %100 = vector.load %arg1[%c1073, %c0_46] : memref<1168x128xf32, #tpu.memory_space<vmem>>, vector<1x128xf32>
    %c1074 = arith.constant 1074 : index
    %c0_47 = arith.constant 0 : index
    %101 = vector.load %arg1[%c1074, %c0_47] : memref<1168x128xf32, #tpu.memory_space<vmem>>, vector<1x64xf32>
    %c1075 = arith.constant 1075 : index
    %c0_48 = arith.constant 0 : index
    %102 = vector.load %arg1[%c1075, %c0_48] : memref<1168x128xf32, #tpu.memory_space<vmem>>, vector<1x64xf32>
    %103 = arith.mulf %94, %0 : vector<8x128xf32>
    %cst_49 = arith.constant dense<0.000000e+00> : vector<8x32xf32>
    %104 = tpu.matmul %103, %95, %cst_49 {dimension_numbers = #tpu.dot_dimension_numbers<[1], [0], [0], [1], [0, 0, 1, 1], [], []>} : vector<8x128xf32>, vector<128x32xf32>, vector<8x32xf32> -> vector<8x32xf32>
    %105 = vector.broadcast %99 : vector<1x32xf32> to vector<8x32xf32>
    %106 = arith.addf %104, %105 : vector<8x32xf32>
    %cst_50 = arith.constant 0.000000e+00 : f32
    %107 = vector.broadcast %cst_50 : f32 to vector<8x32xf32>
    %108 = arith.maximumf %106, %107 : vector<8x32xf32>
    %cst_51 = arith.constant dense<0.000000e+00> : vector<8x128xf32>
    %109 = tpu.matmul %108, %96, %cst_51 {dimension_numbers = #tpu.dot_dimension_numbers<[1], [0], [0], [1], [0, 0, 1, 1], [], []>} : vector<8x32xf32>, vector<32x128xf32>, vector<8x128xf32> -> vector<8x128xf32>
    %110 = vector.broadcast %100 : vector<1x128xf32> to vector<8x128xf32>
    %111 = arith.addf %109, %110 : vector<8x128xf32>
    %112 = arith.negf %111 : vector<8x128xf32>
    %113 = math.exp %112 : vector<8x128xf32>
    %cst_52 = arith.constant 1.000000e+00 : f32
    %114 = vector.broadcast %cst_52 : f32 to vector<8x128xf32>
    %115 = arith.addf %114, %113 : vector<8x128xf32>
    %116 = arith.divf %114, %115 : vector<8x128xf32>
    %c1_i32_53 = arith.constant 1 : i32
    %117 = tpu.dynamic_rotate %116 by %c1_i32_53 dim 1 : vector<8x128xf32>, i32 -> vector<8x128xf32>
    %118 = arith.subf %117, %116 : vector<8x128xf32>
    %119 = math.absf %118 : vector<8x128xf32>
    %120 = arith.addf %79, %119 : vector<8x128xf32>
    %121 = arith.mulf %116, %0 : vector<8x128xf32>
    %cst_54 = arith.constant dense<0.000000e+00> : vector<8x64xf32>
    %122 = tpu.matmul %121, %97, %cst_54 {dimension_numbers = #tpu.dot_dimension_numbers<[1], [0], [0], [1], [0, 0, 1, 1], [], []>} : vector<8x128xf32>, vector<128x64xf32>, vector<8x64xf32> -> vector<8x64xf32>
    %123 = vector.broadcast %101 : vector<1x64xf32> to vector<8x64xf32>
    %124 = arith.addf %122, %123 : vector<8x64xf32>
    %cst_55 = arith.constant 0.000000e+00 : f32
    %125 = vector.broadcast %cst_55 : f32 to vector<8x64xf32>
    %126 = arith.maximumf %124, %125 : vector<8x64xf32>
    %cst_56 = arith.constant dense<0.000000e+00> : vector<8x64xf32>
    %127 = tpu.matmul %126, %98, %cst_56 {dimension_numbers = #tpu.dot_dimension_numbers<[1], [0], [0], [1], [0, 0, 1, 1], [], []>} : vector<8x64xf32>, vector<64x64xf32>, vector<8x64xf32> -> vector<8x64xf32>
    %128 = vector.broadcast %102 : vector<1x64xf32> to vector<8x64xf32>
    %129 = arith.addf %127, %128 : vector<8x64xf32>
    %cst_57 = arith.constant 0.000000e+00 : f32
    %130 = vector.broadcast %cst_57 : f32 to vector<8x64xf32>
    %131 = arith.maximumf %129, %130 : vector<8x64xf32>
    %132 = arith.addf %91, %131 : vector<8x64xf32>
    %c1080 = arith.constant 1080 : index
    %c0_58 = arith.constant 0 : index
    %133 = vector.load %arg1[%c1080, %c0_58] : memref<1168x128xf32, #tpu.memory_space<vmem>>, vector<64x16xf32>
    %c1144 = arith.constant 1144 : index
    %c0_59 = arith.constant 0 : index
    %134 = vector.load %arg1[%c1144, %c0_59] : memref<1168x128xf32, #tpu.memory_space<vmem>>, vector<16x128xf32>
    %c1160 = arith.constant 1160 : index
    %c0_60 = arith.constant 0 : index
    %135 = vector.load %arg1[%c1160, %c0_60] : memref<1168x128xf32, #tpu.memory_space<vmem>>, vector<1x16xf32>
    %c1161 = arith.constant 1161 : index
    %c0_61 = arith.constant 0 : index
    %136 = vector.load %arg1[%c1161, %c0_61] : memref<1168x128xf32, #tpu.memory_space<vmem>>, vector<1x128xf32>
    %cst_62 = arith.constant dense<0.000000e+00> : vector<8x16xf32>
    %137 = tpu.matmul %132, %133, %cst_62 {dimension_numbers = #tpu.dot_dimension_numbers<[1], [0], [0], [1], [0, 0, 1, 1], [], []>} : vector<8x64xf32>, vector<64x16xf32>, vector<8x16xf32> -> vector<8x16xf32>
    %138 = vector.broadcast %135 : vector<1x16xf32> to vector<8x16xf32>
    %139 = arith.addf %137, %138 : vector<8x16xf32>
    %cst_63 = arith.constant 0.000000e+00 : f32
    %140 = vector.broadcast %cst_63 : f32 to vector<8x16xf32>
    %141 = arith.maximumf %139, %140 : vector<8x16xf32>
    %cst_64 = arith.constant dense<0.000000e+00> : vector<8x128xf32>
    %142 = tpu.matmul %141, %134, %cst_64 {dimension_numbers = #tpu.dot_dimension_numbers<[1], [0], [0], [1], [0, 0, 1, 1], [], []>} : vector<8x16xf32>, vector<16x128xf32>, vector<8x128xf32> -> vector<8x128xf32>
    %143 = vector.broadcast %136 : vector<1x128xf32> to vector<8x128xf32>
    %144 = arith.addf %142, %143 : vector<8x128xf32>
    %145 = arith.negf %144 : vector<8x128xf32>
    %146 = math.exp %145 : vector<8x128xf32>
    %cst_65 = arith.constant 1.000000e+00 : f32
    %147 = vector.broadcast %cst_65 : f32 to vector<8x128xf32>
    %148 = arith.addf %147, %146 : vector<8x128xf32>
    %149 = arith.divf %147, %148 : vector<8x128xf32>
    %c0_66 = arith.constant 0 : index
    %c0_67 = arith.constant 0 : index
    %150 = vector.load %arg2[%c0_66, %c0_67] : memref<8x128xf32, #tpu.memory_space<vmem>>, vector<8x128xf32>
    tpu.vector_store %arg2[%c0_66, %c0_67], %149 {strides = array<i32>} : memref<8x128xf32, #tpu.memory_space<vmem>>, vector<8x128xf32>,
    %151 = arith.mulf %120, %12 : vector<8x128xf32>
    %cst_68 = arith.constant dense<0.000000e+00> : vector<8xf32>
    %152 = vector.multi_reduction <add>, %151, %cst_68 [1] : vector<8x128xf32> to vector<8xf32>
    %153 = vector.shape_cast %152 : vector<8xf32> to vector<8x1xf32>
    %cst_69 = arith.constant dense<0.000000e+00> : vector<1xf32>
    %154 = vector.multi_reduction <add>, %153, %cst_69 [0] : vector<8x1xf32> to vector<1xf32>
    %155 = vector.shape_cast %154 : vector<1xf32> to vector<1x1xf32>
    %cst_70 = arith.constant 1.250000e-01 : f32
    %156 = vector.broadcast %cst_70 : f32 to vector<1x1xf32>
    %157 = arith.mulf %155, %156 : vector<1x1xf32>
    %c0_71 = arith.constant 0 : index
    %c0_72 = arith.constant 0 : index
    %158 = vector.load %arg3[%c0_71, %c0_72] : memref<1x1xf32, #tpu.memory_space<vmem>>, vector<1x1xf32>
    tpu.vector_store %arg3[%c0_71, %c0_72], %157 {strides = array<i32>} : memref<1x1xf32, #tpu.memory_space<vmem>>, vector<1x1xf32>,
    return
  }
}

</mosaic_0001>

<bundles_post_ra>
// kernel: tabnet_forward.1
= control target key start
LH: loop header
LB: loop body
LE: loop exit
PB: predicated region body
PF: predicated region fallthrough
CT: control target
= control target key end

     0   :  { %9 = vsyncpa [#allocation3], 0  ;;  %s2176_s0 = inlined_call_operand.vmem [shape: f32[8,128], index: 0, kind: input, shape index: {}]   ;;  %s2177_s1 = inlined_call_operand.hbm [shape: f32[1168,128], index: 1, kind: input, shape index: {}]   ;;  %s2178_s2 = inlined_call_operand.vmem [shape: f32[8,128], index: 2, kind: output, shape index: {0}]   ;;  %s2179_s3 = inlined_call_operand.hbm [shape: f32[1,1], index: 3, kind: output, shape index: {1}]  }
   0x1   :  { %10 = vsyncpa [#allocation4], 0  ;;  %s1925_s12 = smov [#allocation2]  }
   0x2   :  { %s18_s13 = sshll.u32 %s1925_s12, 4  ;;  %s19_s13 = int_to_ptr.vmem [resolvable:$true] %s18_s13 }
   0x3   :  { %s1889_s14 = scalar_lea.vmem %s19_s13, 18688  ;;  %p1894_p1 = scmp.lt.s32.totalorder %s19_s13, %s19_s13 }
   0x4   :  { %p1890_p0 = scmp.ne.s32.totalorder %s19_s13, %s1889_s14  ;;  %p1895_p2 = scmp.lt.s32.totalorder %s1889_s14, %s1889_s14 }
   0x6   :  { %p1896_p3 = por %p1895_p2, %p1894_p1 }
   0x8   :  { %p1897_p4 = pnand %p1896_p3, %p1890_p0 }
   0xa   :  { %1900 = shalt.err (!%p1897_p4)
}
   0xb   :  { %s1926_s15 = smov 128   ;;  %s1927_s16 = smov 8  }
   0xc   :  { %24 = dma.hbm_to_vmem [thread:$0]  %s2177_s1, 18688, %s19_s13, [#allocation3], %s1926_s15, %s1926_s15, %s1927_s16  }
   0xd   :  { %1921 = dma.done.wait [#allocation3], 18688  }
   0xe   :  { %1922 = vsyncadd [#allocation3], 4294948608  ;;  %v1928_v0 = vmov 0.0   ;;  %vm1929_vm0 = vmmov 0   ;;  %v53_v1 = vld [vmem:[#allocation2 + $0x78] sm:$0xff]  ;;  %v52_v2 = vld [vmem:[#allocation2 + $0x70] sm:$0xff] }
   0xf   :  { %1532 = vmatprep.subr.mxu0 %v1928_v0  ;;  %1564 = vmatprep.mubr.msk.f32.mxu0 %vm1929_vm0, %v1928_v0  ;;  %v51_v3 = vld [vmem:[#allocation2 + $0x68] sm:$0xff]  ;;  %v50_v4 = vld [vmem:[#allocation2 + $0x60] sm:$0xff]  ;;  %v57_v5 = vld [vmem:[#allocation2 + $0x98] sm:$0xff]  ;;  %vm165_vm1 = vcmask 261120   ;;  %vm330_vm2 = vcmask 523264   ;;  %vm1328_vm6 = vcmask 0  }
  0x10   :  { %1567 = vmatprep.subr.mxu1 %v1928_v0  ;;  %1575 = vmatprep.mubr.msk.f32.mxu1 %vm1929_vm0, %v1928_v0  ;;  %v49_v6 = vld [vmem:[#allocation2 + $0x58] sm:$0xff]  ;;  %v48_v7 = vld [vmem:[#allocation2 + $0x50] sm:$0xff]  ;;  %v47_v8 = vld [vmem:[#allocation2 + $0x48] sm:$0xff]  ;;  %vm1237_vm7 = vcmask 130048   ;;  %s1931_s20 = smov [#allocation5]  }
  0x11   :  { %1533 = vmatpush3.msra.mxu0 %v53_v1  ;;  %1568 = vmatpush3.msra.mxu1 %v57_v5  ;;  %v46_v9 = vld [vmem:[#allocation2 + $0x40] sm:$0xff]  ;;  %v45_v10 = vld [vmem:[#allocation2 + $0x38] sm:$0xff]  ;;  %v44_v11 = vld [vmem:[#allocation2 + $0x30] sm:$0xff]  ;;  %s1338_s21 = sshll.u32 %s1931_s20, 4  ;;  %s1339_s21 = int_to_ptr.vmem [resolvable:$true] %s1338_s21 }
  0x12   :  { %1534 = vmatprep.subr.mxu0 %v1928_v0  ;;  %1569 = vmatprep.subr.mxu1 %v1928_v0  ;;  %v43_v12 = vld [vmem:[#allocation2 + $0x28] sm:$0xff]  ;;  %v42_v13 = vld [vmem:[#allocation2 + $0x20] sm:$0xff]  ;;  %v41_v14 = vld [vmem:[#allocation2 + $0x18] sm:$0xff]  ;;  %s1901_s22 = scalar_lea.vmem %s1339_s21, 16  ;;  %s1905_s23 = scalar_lea.vmem %s1339_s21, 32 }
  0x13   :  { %1535 = vmatpush3.msra.mxu0 %v52_v2  ;;  %v40_v15 = vld [vmem:[#allocation2 + $0x10] sm:$0xff]  ;;  %v39_v16 = vld [vmem:[#allocation2 + $0x8] sm:$0xff]  ;;  %v38_v17 = vld [vmem:[#allocation2] sm:$0xff]  ;;  %p1902_p5 = scmp.ne.s32.totalorder %s1339_s21, %s1901_s22  ;;  %p1906_p6 = scmp.lt.s32.totalorder %s1339_s21, %s1339_s21 }
  0x14   :  { %1536 = vmatprep.subr.mxu0 %v1928_v0  ;;  %v1979_v18 = vld [vmem:[%s2176_s0] sm:$0xff]  ;;  %v56_v19 = vld [vmem:[#allocation2 + $0x90] sm:$0xff]  ;;  %v55_v20 = vld [vmem:[#allocation2 + $0x88] sm:$0xff]  ;;  %s1930_s0 = smov 1   ;;  %p1907_p7 = scmp.lt.s32.totalorder %s1905_s23, %s1901_s22 }
  0x15   :  { %1537 = vmatpush3.msra.mxu0 %v51_v3  ;;  %1570 = vmatpush3.msra.mxu1 %v56_v19  ;;  %v54_v21 = vld [vmem:[#allocation2 + $0x80] sm:$0xff]  ;;  %v73_v27 = vld [vmem:[#allocation2 + $0x118] sm:$0xff]  ;;  %v72_v28 = vld [vmem:[#allocation2 + $0x110] sm:$0xff] }
  0x16   :  { %1538 = vmatprep.subr.mxu0 %v1928_v0  ;;  %1571 = vmatprep.subr.mxu1 %v1928_v0  ;;  %v1350_v22 = vld [vmem:[#allocation2 + $0x160] ss:$0 sm:$0xff]  ;;  %v71_v29 = vld [vmem:[#allocation2 + $0x108] sm:$0xff]  ;;  %v69_v31 = vld [vmem:[#allocation2 + $0xf8] sm:$0xff]  ;;  %p1908_p8 = por %p1907_p7, %p1906_p6 }
  0x17   :  { %1539 = vmatpush3.msra.mxu0 %v50_v4  ;;  %1572 = vmatpush3.msra.mxu1 %v55_v20  ;;  %v70_v30 = vld [vmem:[#allocation2 + $0x100] sm:$0xff]  ;;  %v68_v32 = vld [vmem:[#allocation2 + $0xf0] sm:$0xff]  ;;  %v67_v33 = vld [vmem:[#allocation2 + $0xe8] sm:$0xff] }
  0x18   :  { %1540 = vmatprep.subr.mxu0 %v1928_v0  ;;  %1573 = vmatprep.subr.mxu1 %v1928_v0  ;;  %v66_v34 = vld [vmem:[#allocation2 + $0xe0] sm:$0xff]  ;;  %v65_v35 = vld [vmem:[#allocation2 + $0xd8] sm:$0xff]  ;;  %v64_v36 = vld [vmem:[#allocation2 + $0xd0] sm:$0xff]  ;;  %p1909_p9 = pnand %p1908_p8, %p1902_p5 }
  0x19   :  { %1541 = vmatpush3.msra.mxu0 %v49_v6  ;;  %1574 = vmatpush3.msra.mxu1 %v54_v21  ;;  %v63_v37 = vld [vmem:[#allocation2 + $0xc8] sm:$0xff]  ;;  %v62_v38 = vld [vmem:[#allocation2 + $0xc0] sm:$0xff]  ;;  %v61_v39 = vld [vmem:[#allocation2 + $0xb8] sm:$0xff] }
  0x1a   :  { %1542 = vmatprep.subr.mxu0 %v1928_v0  ;;  %1578 = vmatprep.subr.mxu1 %v1928_v0  ;;  %v60_v40 = vld [vmem:[#allocation2 + $0xb0] sm:$0xff]  ;;  %v59_v41 = vld [vmem:[#allocation2 + $0xa8] sm:$0xff]  ;;  %v58_v42 = vld [vmem:[#allocation2 + $0xa0] sm:$0xff] }
  0x1b   :  { %1543 = vmatpush3.msra.mxu0 %v48_v7  ;;  %v1351_v43 = vld [vmem:[#allocation2 + $0x161] ss:$0 sm:$0xff]  ;;  %v81_v50 = vld [vmem:[#allocation2 + $0x158] sm:$0xff]  ;;  %v80_v51 = vld [vmem:[#allocation2 + $0x150] sm:$0xff] }
  0x1c   :  { %1544 = vmatprep.subr.mxu0 %v1928_v0  ;;  %v79_v52 = vld [vmem:[#allocation2 + $0x148] sm:$0xff]  ;;  %v78_v53 = vld [vmem:[#allocation2 + $0x140] sm:$0xff]  ;;  %v77_v54 = vld [vmem:[#allocation2 + $0x138] sm:$0xff] }
  0x1d   :  { %1545 = vmatpush3.msra.mxu0 %v47_v8  ;;  %v422_v57 = vld [vmem:[#allocation2 + $0x1e0] sm:$0xff]  ;;  %v421_v58 = vld [vmem:[#allocation2 + $0x1d8] sm:$0xff]  ;;  %v420_v59 = vld [vmem:[#allocation2 + $0x1d0] sm:$0xff] }
  0x1e   :  { %1546 = vmatprep.subr.mxu0 %v1928_v0  ;;  %v419_v60 = vld [vmem:[#allocation2 + $0x1c8] sm:$0xff]  ;;  %v418_v61 = vld [vmem:[#allocation2 + $0x1c0] sm:$0xff]  ;;  %v417_v62 = vld [vmem:[#allocation2 + $0x1b8] sm:$0xff] }
  0x1f   :  { %1547 = vmatpush3.msra.mxu0 %v46_v9  ;;  %v416_v63 = vld [vmem:[#allocation2 + $0x1b0] sm:$0xff]  ;;  %v415_v1 = vld [vmem:[#allocation2 + $0x1a8] sm:$0xff]  ;;  %v414_v2 = vld [vmem:[#allocation2 + $0x1a0] sm:$0xff] }
  0x20   :  { %1548 = vmatprep.subr.mxu0 %v1928_v0  ;;  %v413_v3 = vld [vmem:[#allocation2 + $0x198] sm:$0xff]  ;;  %v412_v4 = vld [vmem:[#allocation2 + $0x190] sm:$0xff]  ;;  %v411_v5 = vld [vmem:[#allocation2 + $0x188] sm:$0xff] }
  0x21   :  { %1549 = vmatpush3.msra.mxu0 %v45_v10  ;;  %v410_v6 = vld [vmem:[#allocation2 + $0x180] sm:$0xff]  ;;  %v409_v7 = vld [vmem:[#allocation2 + $0x178] sm:$0xff]  ;;  %v408_v8 = vld [vmem:[#allocation2 + $0x170] sm:$0xff] }
  0x22   :  { %1550 = vmatprep.subr.mxu0 %v1928_v0  ;;  %v407_v10 = vld [vmem:[#allocation2 + $0x168] sm:$0xff]  ;;  %v426_v21 = vld [vmem:[#allocation2 + $0x200] sm:$0xff] }
  0x23   :  { %1551 = vmatpush3.msra.mxu0 %v44_v11 }
  0x24   :  { %1552 = vmatprep.subr.mxu0 %v1928_v0 }
  0x25   :  { %1553 = vmatpush3.msra.mxu0 %v43_v12  ;;  %v76_v12 = vld [vmem:[#allocation2 + $0x130] sm:$0xff] }
  0x26   :  { %1554 = vmatprep.subr.mxu0 %v1928_v0 }
  0x27   :  { %1555 = vmatpush3.msra.mxu0 %v42_v13  ;;  %v75_v13 = vld [vmem:[#allocation2 + $0x128] sm:$0xff] }
  0x28   :  { %1556 = vmatprep.subr.mxu0 %v1928_v0 }
  0x29   :  { %1557 = vmatpush3.msra.mxu0 %v41_v14  ;;  %v74_v14 = vld [vmem:[#allocation2 + $0x120] sm:$0xff] }
  0x2a   :  { %1558 = vmatprep.subr.mxu0 %v1928_v0 }
  0x2b   :  { %1559 = vmatpush3.msra.mxu0 %v40_v15  ;;  %v1354_v15 = vld [vmem:[#allocation2 + $0x162] ss:$0 sm:$0xff] }
  0x2c   :  { %1560 = vmatprep.subr.mxu0 %v1928_v0 }
  0x2d   :  { %1561 = vmatpush3.msra.mxu0 %v39_v16 }
  0x2e   :  { %1562 = vmatprep.subr.mxu0 %v1928_v0 }
  0x2f   :  { %1563 = vmatpush3.msra.mxu0 %v38_v17 }
  0x30   :  { %1565 = vmatmul.mubr.f32.vlgmr.msra.gmra.mxu0 %v1979_v18  ;;  %1613 = vmatprep.subr.mxu0 %v1928_v0 }
  0x31   :  { %1629 = vmatprep.mubr.msk.f32.mxu0 %vm1929_vm0, %v1928_v0  ;;  %1614 = vmatpush3.msra.mxu0 %v81_v50 }
  0x32   :  { %1615 = vmatprep.subr.mxu0 %v1928_v0 }
  0x33   :  { %1616 = vmatpush3.msra.mxu0 %v80_v51 }
  0x34   :  { %1617 = vmatprep.subr.mxu0 %v1928_v0 }
  0x35   :  { %1618 = vmatpush3.msra.mxu0 %v79_v52 }
  0x36   :  { %1619 = vmatprep.subr.mxu0 %v1928_v0 }
  0x37   :  { %1620 = vmatpush3.msra.mxu0 %v78_v53 }
  0x38   :  { %1621 = vmatprep.subr.mxu0 %v1928_v0 }
  0x39   :  { %1622 = vmatpush3.msra.mxu0 %v77_v54 }
  0x3a   :  { %1623 = vmatprep.subr.mxu0 %v1928_v0 }
  0x3b   :  { %1624 = vmatpush3.msra.mxu0 %v76_v12  ;;  %v780_v12 = vld [vmem:[#allocation2 + $0x2f0] sm:$0xff] }
  0x3c   :  { %1625 = vmatprep.subr.mxu0 %v1928_v0 }
  0x3d   :  { %1626 = vmatpush3.msra.mxu0 %v75_v13  ;;  %v779_v13 = vld [vmem:[#allocation2 + $0x2e8] sm:$0xff] }
  0x3e   :  { %1627 = vmatprep.subr.mxu0 %v1928_v0 }
  0x3f   :  { %1628 = vmatpush3.msra.mxu0 %v74_v14 }
  0x40   :  { %1667 = vmatprep.subr.mxu0 %v1928_v0 }
  0xf0   :  { %v156_v23 = vpop.f32.mrf.mxu0 }
  0xf1   :  { %v157_v24 = vadd.f32 %v1350_v22, %v156_v23  ;;  %v425_v22 = vld [vmem:[#allocation2 + $0x1f8] sm:$0xff]  ;;  %v424_v23 = vld [vmem:[#allocation2 + $0x1f0] sm:$0xff] }
  0xf2   :  { %v1566_v25 = vpop.f32.mrf.mxu0 }
  0xf3   :  { %v160_v26 = vmax.f32 %v157_v24, 0.0  ;;  %v423_v24 = vld [vmem:[#allocation2 + $0x1e8] sm:$0xff] }
  0xf4   :  { %v1357_v25 = vld [vmem:[#allocation2 + $0x2c8] ss:$0 sm:$0xff] }
  0xf5   :  { %1576 = vmatmul.mubr.msk.f32.vlgmr.msra.gmra.mxu1 %vm165_vm1, %v160_v26 }
  0xf6   :  { %1610 = vmatprep.mubr.msk.f32.mxu1 %vm1929_vm0, %v1928_v0  ;;  %1579 = vmatpush3.msra.mxu1 %v73_v27 }
  0xf7   :  { %1580 = vmatprep.subr.mxu1 %v1928_v0 }
  0xf8   :  { %1581 = vmatpush3.msra.mxu1 %v72_v28 }
  0xf9   :  { %1582 = vmatprep.subr.mxu1 %v1928_v0 }
  0xfa   :  { %1583 = vmatpush3.msra.mxu1 %v71_v29 }
  0xfb   :  { %1584 = vmatprep.subr.mxu1 %v1928_v0 }
  0xfc   :  { %1585 = vmatpush3.msra.mxu1 %v70_v30  ;;  %v442_v30 = vld [vmem:[#allocation2 + $0x280] sm:$0xff] }
  0xfd   :  { %1586 = vmatprep.subr.mxu1 %v1928_v0 }
  0xfe   :  { %1587 = vmatpush3.msra.mxu1 %v69_v31  ;;  %v441_v31 = vld [vmem:[#allocation2 + $0x278] sm:$0xff] }
  0xff   :  { %1588 = vmatprep.subr.mxu1 %v1928_v0 }
 0x100   :  { %1589 = vmatpush3.msra.mxu1 %v68_v32  ;;  %v440_v32 = vld [vmem:[#allocation2 + $0x270] sm:$0xff] }
 0x101   :  { %1590 = vmatprep.subr.mxu1 %v1928_v0 }
 0x102   :  { %1591 = vmatpush3.msra.mxu1 %v67_v33  ;;  %v439_v33 = vld [vmem:[#allocation2 + $0x268] sm:$0xff] }
 0x103   :  { %1592 = vmatprep.subr.mxu1 %v1928_v0 }
 0x104   :  { %1593 = vmatpush3.msra.mxu1 %v66_v34  ;;  %v438_v34 = vld [vmem:[#allocation2 + $0x260] sm:$0xff] }
 0x105   :  { %1594 = vmatprep.subr.mxu1 %v1928_v0 }
 0x106   :  { %1595 = vmatpush3.msra.mxu1 %v65_v35  ;;  %v437_v35 = vld [vmem:[#allocation2 + $0x258] sm:$0xff] }
 0x107   :  { %1596 = vmatprep.subr.mxu1 %v1928_v0 }
 0x108   :  { %1597 = vmatpush3.msra.mxu1 %v64_v36  ;;  %v436_v36 = vld [vmem:[#allocation2 + $0x250] sm:$0xff] }
 0x109   :  { %1598 = vmatprep.subr.mxu1 %v1928_v0 }
 0x10a   :  { %1599 = vmatpush3.msra.mxu1 %v63_v37  ;;  %v435_v37 = vld [vmem:[#allocation2 + $0x248] sm:$0xff] }
 0x10b   :  { %1600 = vmatprep.subr.mxu1 %v1928_v0 }
 0x10c   :  { %1601 = vmatpush3.msra.mxu1 %v62_v38  ;;  %v434_v38 = vld [vmem:[#allocation2 + $0x240] sm:$0xff] }
 0x10d   :  { %1602 = vmatprep.subr.mxu1 %v1928_v0 }
 0x10e   :  { %1603 = vmatpush3.msra.mxu1 %v61_v39  ;;  %v433_v39 = vld [vmem:[#allocation2 + $0x238] sm:$0xff] }
 0x10f   :  { %1604 = vmatprep.subr.mxu1 %v1928_v0 }
 0x110   :  { %1605 = vmatpush3.msra.mxu1 %v60_v40  ;;  %v432_v40 = vld [vmem:[#allocation2 + $0x230] sm:$0xff] }
 0x111   :  { %1606 = vmatprep.subr.mxu1 %v1928_v0 }
 0x112   :  { %1607 = vmatpush3.msra.mxu1 %v59_v41  ;;  %v431_v41 = vld [vmem:[#allocation2 + $0x228] sm:$0xff] }
 0x113   :  { %1608 = vmatprep.subr.mxu1 %v1928_v0 }
 0x114   :  { %1609 = vmatpush3.msra.mxu1 %v58_v42  ;;  %v430_v42 = vld [vmem:[#allocation2 + $0x220] sm:$0xff] }
 0x115   :  { %1632 = vmatprep.subr.mxu1 %v1928_v0 }
 0x1b5   :  { %v235_v44 = vpop.f32.mrf.mxu1 }
 0x1b6   :  { %v236_v45 = vadd.f32 %v1351_v43, %v235_v44  ;;  %v429_v43 = vld [vmem:[#allocation2 + $0x218] sm:$0xff]  ;;  %v428_v44 = vld [vmem:[#allocation2 + $0x210] sm:$0xff] }
 0x1b7   :  { %v1577_v46 = vpop.f32.mrf.mxu1 }
 0x1b8   :  { %v1353_v47 = vmul.f32 -1.442695, %v236_v45  ;;  %v427_v45 = vld [vmem:[#allocation2 + $0x208] sm:$0xff] }
 0x1ba   :  { %1865 = vpow2.f32 %v1353_v47 }
 0x1c7   :  { %v1866_v48 = vpop.eup %1865 }
 0x1c8   :  { %v242_v49 = vadd.f32 1.0, %v1866_v48  ;;  %v1358_v48 = vld [vmem:[#allocation2 + $0x2c9] ss:$0 sm:$0xff] }
 0x1ca   :  { %1867 = vrcp.f32 %v242_v49 }
 0x1d7   :  { %v2012_v55 = vpop.eup %1867 }
 0x1d8   :  { %245 = vrot.lane.b32.xlu0 %v2012_v55, %s1930_s0  ;;  %v250_v56 = vmul.f32 %v2012_v55, %v1979_v18  ;;  %v406_v9 = vsub.f32 1.3, %v2012_v55 }
 0x1da   :  { %1611 = vmatmul.mubr.f32.vlgmr.msra.gmra.mxu1 %v250_v56  ;;  %v455_v11 = vmul.f32 %v406_v9, %v1979_v18  ;;  %v450_v56 = vld [vmem:[#allocation2 + $0x2c0] sm:$0xff] }
 0x1db   :  { %1633 = vmatpush3.msra.mxu1 %v422_v57  ;;  %1664 = vmatprep.mubr.msk.f32.mxu1 %vm1929_vm0, %v1928_v0  ;;  %v449_v57 = vld [vmem:[#allocation2 + $0x2b8] sm:$0xff] }
 0x1dc   :  { %1634 = vmatprep.subr.mxu1 %v1928_v0 }
 0x1dd   :  { %1635 = vmatpush3.msra.mxu1 %v421_v58  ;;  %v448_v58 = vld [vmem:[#allocation2 + $0x2b0] sm:$0xff] }
 0x1de   :  { %1636 = vmatprep.subr.mxu1 %v1928_v0 }
 0x1df   :  { %1637 = vmatpush3.msra.mxu1 %v420_v59  ;;  %v447_v59 = vld [vmem:[#allocation2 + $0x2a8] sm:$0xff] }
 0x1e0   :  { %1638 = vmatprep.subr.mxu1 %v1928_v0 }
 0x1e1   :  { %1639 = vmatpush3.msra.mxu1 %v419_v60  ;;  %v446_v60 = vld [vmem:[#allocation2 + $0x2a0] sm:$0xff] }
 0x1e2   :  { %1640 = vmatprep.subr.mxu1 %v1928_v0 }
 0x1e3   :  { %1641 = vmatpush3.msra.mxu1 %v418_v61 }
 0x1e4   :  { %1642 = vmatprep.subr.mxu1 %v1928_v0 }
 0x1e5   :  { %1643 = vmatpush3.msra.mxu1 %v417_v62 }
 0x1e6   :  { %1644 = vmatprep.subr.mxu1 %v1928_v0 }
 0x1e7   :  { %1645 = vmatpush3.msra.mxu1 %v416_v63  ;;  %v791_v63 = vld [vmem:[#allocation2 + $0x348] sm:$0xff] }
 0x1e8   :  { %1646 = vmatprep.subr.mxu1 %v1928_v0 }
 0x1e9   :  { %1647 = vmatpush3.msra.mxu1 %v415_v1  ;;  %v790_v1 = vld [vmem:[#allocation2 + $0x340] sm:$0xff] }
 0x1ea   :  { %1648 = vmatprep.subr.mxu1 %v1928_v0 }
 0x1eb   :  { %1649 = vmatpush3.msra.mxu1 %v414_v2  ;;  %v789_v2 = vld [vmem:[#allocation2 + $0x338] sm:$0xff] }
 0x1ec   :  { %1650 = vmatprep.subr.mxu1 %v1928_v0 }
 0x1ed   :  { %1651 = vmatpush3.msra.mxu1 %v413_v3  ;;  %v788_v3 = vld [vmem:[#allocation2 + $0x330] sm:$0xff] }
 0x1ee   :  { %1652 = vmatprep.subr.mxu1 %v1928_v0 }
 0x1ef   :  { %1653 = vmatpush3.msra.mxu1 %v412_v4  ;;  %v787_v4 = vld [vmem:[#allocation2 + $0x328] sm:$0xff] }
 0x1f0   :  { %1654 = vmatprep.subr.mxu1 %v1928_v0 }
 0x1f1   :  { %1655 = vmatpush3.msra.mxu1 %v411_v5  ;;  %v786_v5 = vld [vmem:[#allocation2 + $0x320] sm:$0xff] }
 0x1f2   :  { %1656 = vmatprep.subr.mxu1 %v1928_v0 }
 0x1f3   :  { %1657 = vmatpush3.msra.mxu1 %v410_v6  ;;  %v785_v6 = vld [vmem:[#allocation2 + $0x318] sm:$0xff] }
 0x1f4   :  { %1658 = vmatprep.subr.mxu1 %v1928_v0 }
 0x1f5   :  { %1659 = vmatpush3.msra.mxu1 %v409_v7  ;;  %v784_v7 = vld [vmem:[#allocation2 + $0x310] sm:$0xff] }
 0x1f6   :  { %1660 = vmatprep.subr.mxu1 %v1928_v0 }
 0x1f7   :  { %1661 = vmatpush3.msra.mxu1 %v408_v8  ;;  %v783_v8 = vld [vmem:[#allocation2 + $0x308] sm:$0xff] }
 0x1f8   :  { %1662 = vmatprep.subr.mxu1 %v1928_v0 }
 0x1f9   :  { %1663 = vmatpush3.msra.mxu1 %v407_v10  ;;  %v782_v10 = vld [vmem:[#allocation2 + $0x300] sm:$0xff] }
 0x1fa   :  { %1665 = vmatmul.mubr.f32.vlgmr.msra.gmra.mxu1 %v455_v11  ;;  %1713 = vmatprep.subr.mxu1 %v1928_v0  ;;  %v781_v11 = vld [vmem:[#allocation2 + $0x2f8] sm:$0xff] }
 0x1fb   :  { %1729 = vmatprep.mubr.msk.f32.mxu1 %vm1929_vm0, %v1928_v0  ;;  %1714 = vmatpush3.msra.mxu1 %v450_v56  ;;  %v1362_v56 = vld [vmem:[#allocation2 + $0x2cb] ss:$0 sm:$0xff] }
 0x1fc   :  { %1715 = vmatprep.subr.mxu1 %v1928_v0 }
 0x1fd   :  { %1716 = vmatpush3.msra.mxu1 %v449_v57 }
 0x1fe   :  { %1717 = vmatprep.subr.mxu1 %v1928_v0 }
 0x1ff   :  { %1718 = vmatpush3.msra.mxu1 %v448_v58 }
 0x200   :  { %1719 = vmatprep.subr.mxu1 %v1928_v0 }
 0x201   :  { %1720 = vmatpush3.msra.mxu1 %v447_v59 }
 0x202   :  { %1721 = vmatprep.subr.mxu1 %v1928_v0 }
 0x203   :  { %1722 = vmatpush3.msra.mxu1 %v446_v60 }
 0x204   :  { %1723 = vmatprep.subr.mxu1 %v1928_v0 }
 0x29a   :  { %v321_v16 = vpop.f32.mrf.mxu1 }
 0x29b   :  { %v322_v17 = vadd.f32 %v1354_v15, %v321_v16  ;;  %v778_v15 = vld [vmem:[#allocation2 + $0x2e0] sm:$0xff]  ;;  %v777_v16 = vld [vmem:[#allocation2 + $0x2d8] sm:$0xff] }
 0x29c   :  { %v1612_v19 = vpop.f32.mrf.mxu1 }
 0x29d   :  { %v325_v20 = vmax.f32 %v322_v17, 0.0  ;;  %v776_v19 = vld [vmem:[#allocation2 + $0x2d0] sm:$0xff] }
 0x29f   :  { %1630 = vmatmul.mubr.msk.f32.vlgmr.msra.gmra.mxu0 %vm330_vm2, %v325_v20 }
 0x2a0   :  { %1668 = vmatpush3.msra.mxu0 %v426_v21  ;;  %1675 = vmatprep.mubr.msk.f32.mxu0 %vm1929_vm0, %v1928_v0  ;;  %v445_v21 = vld [vmem:[#allocation2 + $0x298] sm:$0xff] }
 0x2a1   :  { %1669 = vmatprep.subr.mxu0 %v1928_v0  ;;  %1724 = vmatpush3.msra.mxu1 %v445_v21  ;;  %v246_v21 = vpop.permute.xlu0 %245 }
 0x2a2   :  { %1670 = vmatpush3.msra.mxu0 %v425_v22  ;;  %1725 = vmatprep.subr.mxu1 %v1928_v0  ;;  %v443_v22 = vld [vmem:[#allocation2 + $0x288] sm:$0xff] }
 0x2a3   :  { %1671 = vmatprep.subr.mxu0 %v1928_v0 }
 0x2a4   :  { %1672 = vmatpush3.msra.mxu0 %v424_v23  ;;  %v1361_v23 = vld [vmem:[#allocation2 + $0x2ca] ss:$0 sm:$0xff] }
 0x2a5   :  { %1673 = vmatprep.subr.mxu0 %v1928_v0 }
 0x2a6   :  { %1674 = vmatpush3.msra.mxu0 %v423_v24 }
 0x2a7   :  { %1678 = vmatprep.subr.mxu0 %v1928_v0 }
 0x2ba   :  { %v526_v26 = vpop.f32.mrf.mxu1 }
 0x2bb   :  { %v527_v27 = vadd.f32 %v1357_v25, %v526_v26 }
 0x2bc   :  { %v1666_v28 = vpop.f32.mrf.mxu1 }
 0x2bd   :  { %v530_v29 = vmax.f32 %v527_v27, 0.0  ;;  %v795_v28 = vld [vmem:[#allocation2 + $0x368] sm:$0xff] }
 0x2bf   :  { %1676 = vmatmul.mubr.msk.f32.vlgmr.msra.gmra.mxu0 %vm165_vm1, %v530_v29  ;;  %v794_v29 = vld [vmem:[#allocation2 + $0x360] sm:$0xff] }
 0x2c0   :  { %1710 = vmatprep.mubr.msk.f32.mxu0 %vm1929_vm0, %v1928_v0  ;;  %1679 = vmatpush3.msra.mxu0 %v442_v30  ;;  %v793_v30 = vld [vmem:[#allocation2 + $0x358] sm:$0xff] }
 0x2c1   :  { %1680 = vmatprep.subr.mxu0 %v1928_v0 }
 0x2c2   :  { %1681 = vmatpush3.msra.mxu0 %v441_v31  ;;  %v792_v31 = vld [vmem:[#allocation2 + $0x350] sm:$0xff] }
 0x2c3   :  { %1682 = vmatprep.subr.mxu0 %v1928_v0 }
 0x2c4   :  { %1683 = vmatpush3.msra.mxu0 %v440_v32  ;;  %v1364_v32 = vld [vmem:[#allocation2 + $0x430] ss:$0 sm:$0xff] }
 0x2c5   :  { %1684 = vmatprep.subr.mxu0 %v1928_v0 }
 0x2c6   :  { %1685 = vmatpush3.msra.mxu0 %v439_v33 }
 0x2c7   :  { %1686 = vmatprep.subr.mxu0 %v1928_v0 }
 0x2c8   :  { %1687 = vmatpush3.msra.mxu0 %v438_v34 }
 0x2c9   :  { %1688 = vmatprep.subr.mxu0 %v1928_v0 }
 0x2ca   :  { %1689 = vmatpush3.msra.mxu0 %v437_v35 }
 0x2cb   :  { %1690 = vmatprep.subr.mxu0 %v1928_v0 }
 0x2cc   :  { %1691 = vmatpush3.msra.mxu0 %v436_v36 }
 0x2cd   :  { %1692 = vmatprep.subr.mxu0 %v1928_v0 }
 0x2ce   :  { %1693 = vmatpush3.msra.mxu0 %v435_v37  ;;  %v811_v37 = vld [vmem:[#allocation2 + $0x3e8] sm:$0xff] }
 0x2cf   :  { %1694 = vmatprep.subr.mxu0 %v1928_v0 }
 0x2d0   :  { %1695 = vmatpush3.msra.mxu0 %v434_v38  ;;  %v810_v38 = vld [vmem:[#allocation2 + $0x3e0] sm:$0xff] }
 0x2d1   :  { %1696 = vmatprep.subr.mxu0 %v1928_v0 }
 0x2d2   :  { %1697 = vmatpush3.msra.mxu0 %v433_v39  ;;  %v809_v39 = vld [vmem:[#allocation2 + $0x3d8] sm:$0xff] }
 0x2d3   :  { %1698 = vmatprep.subr.mxu0 %v1928_v0 }
 0x2d4   :  { %1699 = vmatpush3.msra.mxu0 %v432_v40  ;;  %v808_v40 = vld [vmem:[#allocation2 + $0x3d0] sm:$0xff] }
 0x2d5   :  { %1700 = vmatprep.subr.mxu0 %v1928_v0 }
 0x2d6   :  { %1701 = vmatpush3.msra.mxu0 %v431_v41  ;;  %v807_v41 = vld [vmem:[#allocation2 + $0x3c8] sm:$0xff] }
 0x2d7   :  { %1702 = vmatprep.subr.mxu0 %v1928_v0 }
 0x2d8   :  { %1703 = vmatpush3.msra.mxu0 %v430_v42  ;;  %v806_v42 = vld [vmem:[#allocation2 + $0x3c0] sm:$0xff] }
 0x2d9   :  { %1704 = vmatprep.subr.mxu0 %v1928_v0 }
 0x2da   :  { %1705 = vmatpush3.msra.mxu0 %v429_v43  ;;  %v805_v43 = vld [vmem:[#allocation2 + $0x3b8] sm:$0xff] }
 0x2db   :  { %1706 = vmatprep.subr.mxu0 %v1928_v0 }
 0x2dc   :  { %1707 = vmatpush3.msra.mxu0 %v428_v44  ;;  %v804_v44 = vld [vmem:[#allocation2 + $0x3b0] sm:$0xff] }
 0x2dd   :  { %1708 = vmatprep.subr.mxu0 %v1928_v0 }
 0x2de   :  { %1709 = vmatpush3.msra.mxu0 %v427_v45  ;;  %v803_v45 = vld [vmem:[#allocation2 + $0x3a8] sm:$0xff] }
 0x2df   :  { %1732 = vmatprep.subr.mxu0 %v1928_v0 }
 0x35f   :  { %v2072_v46 = vpop.f32.mrf.mxu0 }
 0x361   :  { %v1631_v47 = vpop.f32.mrf.mxu0 }
 0x362   :  { %v802_v47 = vld [vmem:[#allocation2 + $0x3a0] sm:$0xff] }
 0x37f   :  { %v604_v49 = vpop.f32.mrf.mxu0 }
 0x380   :  { %v605_v50 = vadd.f32 %v1358_v48, %v604_v49  ;;  %v801_v48 = vld [vmem:[#allocation2 + $0x398] sm:$0xff]  ;;  %v800_v49 = vld [vmem:[#allocation2 + $0x390] sm:$0xff] }
 0x381   :  { %v1677_v51 = vpop.f32.mrf.mxu0 }
 0x382   :  { %v1360_v52 = vmul.f32 -1.442695, %v605_v50  ;;  %v799_v50 = vld [vmem:[#allocation2 + $0x388] sm:$0xff]  ;;  %v798_v51 = vld [vmem:[#allocation2 + $0x380] sm:$0xff] }
 0x384   :  { %1869 = vpow2.f32 %v1360_v52  ;;  %v797_v52 = vld [vmem:[#allocation2 + $0x378] sm:$0xff] }
 0x391   :  { %v1870_v53 = vpop.eup %1869 }
 0x392   :  { %v611_v54 = vadd.f32 1.0, %v1870_v53  ;;  %v796_v53 = vld [vmem:[#allocation2 + $0x370] sm:$0xff] }
 0x394   :  { %1871 = vrcp.f32 %v611_v54  ;;  %v1355_v54 = vld [vmem:[#allocation2 + $0x163] ss:$0 sm:$0xff] }
 0x395   :  { %v401_v57 = vadd.f32 %v1355_v54, %v2072_v46  ;;  %v817_v46 = vld [vmem:[#allocation2 + $0x418] sm:$0xff]  ;;  %v1369_v54 = vld [vmem:[#allocation2 + $0x433] ss:$0 sm:$0xff] }
 0x3a1   :  { %v2077_v61 = vpop.eup %1871 }
 0x3a2   :  { %614 = vrot.lane.b32.xlu0 %v2077_v61, %s1930_s0  ;;  %v619_v62 = vmul.f32 %v2077_v61, %v1979_v18  ;;  %v774_v14 = vsub.f32 1.3, %v2077_v61 }
 0x3a4   :  { %1711 = vmatmul.mubr.f32.vlgmr.msra.gmra.mxu0 %v619_v62  ;;  %v775_v17 = vmul.f32 %v774_v14, %v406_v9  ;;  %v444_v9 = vld [vmem:[#allocation2 + $0x290] sm:$0xff]  ;;  %v404_v62 = vmax.f32 %v401_v57, 0.0 }
 0x3a5   :  { %1733 = vmatpush3.msra.mxu0 %v791_v63  ;;  %1764 = vmatprep.mubr.msk.f32.mxu0 %vm1929_vm0, %v1928_v0 }
 0x3a6   :  { %1734 = vmatprep.subr.mxu0 %v1928_v0  ;;  %v824_v20 = vmul.f32 %v775_v17, %v1979_v18  ;;  %1726 = vmatpush3.msra.mxu1 %v444_v9  ;;  %v815_v17 = vld [vmem:[#allocation2 + $0x408] sm:$0xff] }
 0x3a7   :  { %1735 = vmatpush3.msra.mxu0 %v790_v1  ;;  %1727 = vmatprep.subr.mxu1 %v1928_v0 }
 0x3a8   :  { %1736 = vmatprep.subr.mxu0 %v1928_v0  ;;  %1728 = vmatpush3.msra.mxu1 %v443_v22 }
 0x3a9   :  { %1737 = vmatpush3.msra.mxu0 %v789_v2  ;;  %1767 = vmatprep.subr.mxu1 %v1928_v0  ;;  %v1365_v2 = vld [vmem:[#allocation2 + $0x431] ss:$0 sm:$0xff] }
 0x3aa   :  { %1738 = vmatprep.subr.mxu0 %v1928_v0 }
 0x3ab   :  { %1739 = vmatpush3.msra.mxu0 %v788_v3 }
 0x3ac   :  { %1740 = vmatprep.subr.mxu0 %v1928_v0 }
 0x3ad   :  { %1741 = vmatpush3.msra.mxu0 %v787_v4 }
 0x3ae   :  { %1742 = vmatprep.subr.mxu0 %v1928_v0 }
 0x3af   :  { %1743 = vmatpush3.msra.mxu0 %v786_v5 }
 0x3b0   :  { %1744 = vmatprep.subr.mxu0 %v1928_v0 }
 0x3b1   :  { %1745 = vmatpush3.msra.mxu0 %v785_v6 }
 0x3b2   :  { %1746 = vmatprep.subr.mxu0 %v1928_v0 }
 0x3b3   :  { %1747 = vmatpush3.msra.mxu0 %v784_v7 }
 0x3b4   :  { %1748 = vmatprep.subr.mxu0 %v1928_v0 }
 0x3b5   :  { %1749 = vmatpush3.msra.mxu0 %v783_v8 }
 0x3b6   :  { %1750 = vmatprep.subr.mxu0 %v1928_v0 }
 0x3b7   :  { %1751 = vmatpush3.msra.mxu0 %v782_v10  ;;  %v29_v10 = vlaneseq }
 0x3b8   :  { %1752 = vmatprep.subr.mxu0 %v1928_v0 }
 0x3b9   :  { %1753 = vmatpush3.msra.mxu0 %v781_v11  ;;  %v819_v11 = vld [vmem:[#allocation2 + $0x428] sm:$0xff] }
 0x3ba   :  { %1754 = vmatprep.subr.mxu0 %v1928_v0 }
 0x3bb   :  { %1755 = vmatpush3.msra.mxu0 %v780_v12  ;;  %v818_v12 = vld [vmem:[#allocation2 + $0x420] sm:$0xff] }
 0x3bc   :  { %1756 = vmatprep.subr.mxu0 %v1928_v0 }
 0x3bd   :  { %1757 = vmatpush3.msra.mxu0 %v779_v13 }
 0x3be   :  { %1758 = vmatprep.subr.mxu0 %v1928_v0 }
 0x3bf   :  { %1759 = vmatpush3.msra.mxu0 %v778_v15  ;;  %v30_v15 = vand.u32 127, %v29_v10 }
 0x3c0   :  { %1760 = vmatprep.subr.mxu0 %v1928_v0 }
 0x3c1   :  { %1761 = vmatpush3.msra.mxu0 %v777_v16  ;;  %v816_v16 = vld [vmem:[#allocation2 + $0x410] sm:$0xff]  ;;  %vm33_vm3 = vcmp.lt.s32.totalorder %v30_v15, 16 }
 0x3c2   :  { %1762 = vmatprep.subr.mxu0 %v1928_v0 }
 0x3c3   :  { %1763 = vmatpush3.msra.mxu0 %v776_v19  ;;  %v813_v19 = vld [vmem:[#allocation2 + $0x3f8] sm:$0xff] }
 0x3c4   :  { %1765 = vmatmul.mubr.f32.vlgmr.msra.gmra.mxu0 %v824_v20  ;;  %1813 = vmatprep.subr.mxu0 %v1928_v0  ;;  %v812_v20 = vld [vmem:[#allocation2 + $0x3f0] sm:$0xff] }
 0x3c5   :  { %1829 = vmatprep.mubr.msk.f32.mxu0 %vm1929_vm0, %v1928_v0  ;;  %1814 = vmatpush3.msra.mxu0 %v819_v11 }
 0x3c6   :  { %1815 = vmatprep.subr.mxu0 %v1928_v0 }
 0x3c7   :  { %1816 = vmatpush3.msra.mxu0 %v818_v12 }
 0x3c8   :  { %1817 = vmatprep.subr.mxu0 %v1928_v0 }
 0x3c9   :  { %1818 = vmatpush3.msra.mxu0 %v817_v46 }
 0x3ca   :  { %1819 = vmatprep.subr.mxu0 %v1928_v0 }
 0x3cb   :  { %1820 = vmatpush3.msra.mxu0 %v816_v16 }
 0x3cc   :  { %1821 = vmatprep.subr.mxu0 %v1928_v0 }
 0x3cd   :  { %1822 = vmatpush3.msra.mxu0 %v815_v17 }
 0x3ce   :  { %1823 = vmatprep.subr.mxu0 %v1928_v0 }
 0x414   :  { %v615_v9 = vpop.permute.xlu0 %614 }
 0x415   :  { %v616_v22 = vsub.f32 %v615_v9, %v2077_v61  ;;  %v1147_v61 = vld [vmem:[#allocation2 + $0x458] sm:$0xff] }
 0x464   :  { %v690_v24 = vpop.f32.mrf.mxu0 }
 0x465   :  { %v691_v25 = vadd.f32 %v1361_v23, %v690_v24  ;;  %v247_v23 = vsub.f32 %v246_v21, %v2012_v55  ;;  %v617_v24 = vand.u32 2147483647, %v616_v22  ;;  %v1148_v55 = vld [vmem:[#allocation2 + $0x460] sm:$0xff] }
 0x466   :  { %v1712_v26 = vpop.f32.mrf.mxu0 }
 0x467   :  { %v694_v27 = vmax.f32 %v691_v25, 0.0  ;;  %v248_v26 = vand.u32 2147483647, %v247_v23 }
 0x469   :  { %1730 = vmatmul.mubr.msk.f32.vlgmr.msra.gmra.mxu1 %vm330_vm2, %v694_v27 }
 0x46a   :  { %1768 = vmatpush3.msra.mxu1 %v795_v28  ;;  %1775 = vmatprep.mubr.msk.f32.mxu1 %vm1929_vm0, %v1928_v0  ;;  %v618_v28 = vadd.f32 %v617_v24, %v248_v26 }
 0x46b   :  { %1769 = vmatprep.subr.mxu1 %v1928_v0 }
 0x46c   :  { %1770 = vmatpush3.msra.mxu1 %v794_v29 }
 0x46d   :  { %1771 = vmatprep.subr.mxu1 %v1928_v0 }
 0x46e   :  { %1772 = vmatpush3.msra.mxu1 %v793_v30 }
 0x46f   :  { %1773 = vmatprep.subr.mxu1 %v1928_v0 }
 0x470   :  { %1774 = vmatpush3.msra.mxu1 %v792_v31 }
 0x471   :  { %1778 = vmatprep.subr.mxu1 %v1928_v0 }
 0x484   :  { %v895_v33 = vpop.f32.mrf.mxu0 }
 0x485   :  { %v896_v34 = vadd.f32 %v1364_v32, %v895_v33 }
 0x486   :  { %v1766_v35 = vpop.f32.mrf.mxu0 }
 0x487   :  { %v899_v36 = vmax.f32 %v896_v34, 0.0  ;;  %v1150_v34 = vld [vmem:[#allocation2 + $0x470] sm:$0xff]  ;;  %v1149_v35 = vld [vmem:[#allocation2 + $0x468] sm:$0xff] }
 0x489   :  { %1776 = vmatmul.mubr.msk.f32.vlgmr.msra.gmra.mxu1 %vm165_vm1, %v899_v36  ;;  %v1368_v36 = vld [vmem:[#allocation2 + $0x432] ss:$0 sm:$0xff] }
 0x48a   :  { %1810 = vmatprep.mubr.msk.f32.mxu1 %vm1929_vm0, %v1928_v0  ;;  %1779 = vmatpush3.msra.mxu1 %v811_v37 }
 0x48b   :  { %1780 = vmatprep.subr.mxu1 %v1928_v0 }
 0x48c   :  { %1781 = vmatpush3.msra.mxu1 %v810_v38 }
 0x48d   :  { %1782 = vmatprep.subr.mxu1 %v1928_v0 }
 0x48e   :  { %1783 = vmatpush3.msra.mxu1 %v809_v39 }
 0x48f   :  { %1784 = vmatprep.subr.mxu1 %v1928_v0 }
 0x490   :  { %1785 = vmatpush3.msra.mxu1 %v808_v40 }
 0x491   :  { %1786 = vmatprep.subr.mxu1 %v1928_v0 }
 0x492   :  { %1787 = vmatpush3.msra.mxu1 %v807_v41 }
 0x493   :  { %1788 = vmatprep.subr.mxu1 %v1928_v0 }
 0x494   :  { %1789 = vmatpush3.msra.mxu1 %v806_v42 }
 0x495   :  { %1790 = vmatprep.subr.mxu1 %v1928_v0 }
 0x496   :  { %1791 = vmatpush3.msra.mxu1 %v805_v43  ;;  %v1146_v43 = vld [vmem:[#allocation2 + $0x450] sm:$0xff] }
 0x497   :  { %1792 = vmatprep.subr.mxu1 %v1928_v0 }
 0x498   :  { %1793 = vmatpush3.msra.mxu1 %v804_v44 }
 0x499   :  { %1794 = vmatprep.subr.mxu1 %v1928_v0 }
 0x49a   :  { %1795 = vmatpush3.msra.mxu1 %v803_v45  ;;  %v1145_v45 = vld [vmem:[#allocation2 + $0x448] sm:$0xff] }
 0x49b   :  { %1796 = vmatprep.subr.mxu1 %v1928_v0 }
 0x49c   :  { %1797 = vmatpush3.msra.mxu1 %v802_v47 }
 0x49d   :  { %1798 = vmatprep.subr.mxu1 %v1928_v0 }
 0x49e   :  { %1799 = vmatpush3.msra.mxu1 %v801_v48  ;;  %v1144_v48 = vld [vmem:[#allocation2 + $0x440] sm:$0xff] }
 0x49f   :  { %1800 = vmatprep.subr.mxu1 %v1928_v0 }
 0x4a0   :  { %1801 = vmatpush3.msra.mxu1 %v800_v49 }
 0x4a1   :  { %1802 = vmatprep.subr.mxu1 %v1928_v0 }
 0x4a2   :  { %1803 = vmatpush3.msra.mxu1 %v799_v50  ;;  %v1143_v50 = vld [vmem:[#allocation2 + $0x438] sm:$0xff] }
 0x4a3   :  { %1804 = vmatprep.subr.mxu1 %v1928_v0 }
 0x4a4   :  { %1805 = vmatpush3.msra.mxu1 %v798_v51 }
 0x4a5   :  { %1806 = vmatprep.subr.mxu1 %v1928_v0 }
 0x4a6   :  { %1807 = vmatpush3.msra.mxu1 %v797_v52 }
 0x4a7   :  { %1808 = vmatprep.subr.mxu1 %v1928_v0 }
 0x4a8   :  { %1809 = vmatpush3.msra.mxu1 %v796_v53 }
 0x4a9   :  { %1832 = vmatprep.subr.mxu1 %v1928_v0 }
 0x529   :  { %v768_v58 = vpop.f32.mrf.mxu1 }
 0x52a   :  { %v769_v59 = vadd.f32 %v1362_v56, %v768_v58 }
 0x52b   :  { %v1731_v60 = vpop.f32.mrf.mxu1 }
 0x52c   :  { %v772_v63 = vmax.f32 %v769_v59, 0.0 }
 0x52e   :  { %v2139_v1 = vadd.f32 %v772_v63, %v404_v62  ;;  %v1152_v62 = vld [vmem:[#allocation2 + $0x480] sm:$0xff]  ;;  %v1151_v63 = vld [vmem:[#allocation2 + $0x478] sm:$0xff] }
 0x549   :  { %v973_v3 = vpop.f32.mrf.mxu1 }
 0x54a   :  { %v974_v4 = vadd.f32 %v1365_v2, %v973_v3  ;;  %v1371_v2 = vld [vmem:[#allocation2 + $0x488] ss:$0 sm:$0xff] }
 0x54b   :  { %v1777_v5 = vpop.f32.mrf.mxu1 }
 0x54c   :  { %v1367_v6 = vmul.f32 -1.442695, %v974_v4 }
 0x54e   :  { %1873 = vpow2.f32 %v1367_v6 }
 0x55b   :  { %v1874_v7 = vpop.eup %1873 }
 0x55c   :  { %v980_v8 = vadd.f32 1.0, %v1874_v7 }
 0x55e   :  { %1875 = vrcp.f32 %v980_v8 }
 0x56b   :  { %v1876_v13 = vpop.eup %1875 }
 0x56c   :  { %983 = vrot.lane.b32.xlu1 %v1876_v13, %s1930_s0  ;;  %v988_v14 = vmul.f32 %v1876_v13, %v1979_v18  ;;  %v814_v18 = vld [vmem:[#allocation2 + $0x400] sm:$0xff] }
 0x56d   :  { %1824 = vmatpush3.msra.mxu0 %v814_v18 }
 0x56e   :  { %1811 = vmatmul.mubr.f32.vlgmr.msra.gmra.mxu1 %v988_v14  ;;  %1825 = vmatprep.subr.mxu0 %v1928_v0 }
 0x56f   :  { %1848 = vmatprep.mubr.msk.f32.mxu1 %vm1929_vm0, %v1928_v0  ;;  %1826 = vmatpush3.msra.mxu0 %v813_v19 }
 0x570   :  { %31 = vrot.lane.b32.xlu1 %v30_v15, %s1930_s0  ;;  %1827 = vmatprep.subr.mxu0 %v1928_v0 }
 0x571   :  { %1828 = vmatpush3.msra.mxu0 %v812_v20  ;;  %1833 = vmatpush3.msra.mxu1 %v1150_v34 }
 0x572   :  { %1851 = vmatprep.subr.mxu0 %v1928_v0  ;;  %1834 = vmatprep.subr.mxu1 %v1928_v0 }
 0x573   :  { %1835 = vmatpush3.msra.mxu1 %v1149_v35 }
 0x574   :  { %1836 = vmatprep.subr.mxu1 %v1928_v0 }
 0x575   :  { %1837 = vmatpush3.msra.mxu1 %v1148_v55 }
 0x576   :  { %1838 = vmatprep.subr.mxu1 %v1928_v0 }
 0x577   :  { %1839 = vmatpush3.msra.mxu1 %v1147_v61 }
 0x578   :  { %1840 = vmatprep.subr.mxu1 %v1928_v0 }
 0x579   :  { %1841 = vmatpush3.msra.mxu1 %v1146_v43 }
 0x57a   :  { %1842 = vmatprep.subr.mxu1 %v1928_v0 }
 0x57b   :  { %1843 = vmatpush3.msra.mxu1 %v1145_v45 }
 0x57c   :  { %1844 = vmatprep.subr.mxu1 %v1928_v0 }
 0x57d   :  { %1845 = vmatpush3.msra.mxu1 %v1144_v48 }
 0x57e   :  { %1846 = vmatprep.subr.mxu1 %v1928_v0 }
 0x57f   :  { %1847 = vmatpush3.msra.mxu1 %v1143_v50 }
 0x5de   :  { %v984_v25 = vpop.permute.xlu1 %983 }
 0x5df   :  { %v985_v27 = vsub.f32 %v984_v25, %v1876_v13 }
 0x5e1   :  { %v986_v29 = vand.u32 2147483647, %v985_v27 }
 0x5e2   :  { %v32_v30 = vpop.permute.xlu1 %31 }
 0x5e3   :  { %v987_v31 = vadd.f32 %v986_v29, %v618_v28  ;;  %vm34_vm4 = vcmp.lt.s32.totalorder %v32_v30, 16 }
 0x5e4   :  { %vm35_vm5 = vmand %vm33_vm3, %vm34_vm4 }
 0x5e5   :  { %v1349_v32 = vsel %vm35_vm5, 1.0, %v1928_v0 }
 0x5e6   :  { %v1318_v33 = vmul.f32 %v1349_v32, %v987_v31 }
 0x5e8   :  { %1319 = vadd.xlane.f32.xlu0 %v1318_v33 }
 0x62e   :  { %v1059_v37 = vpop.f32.mrf.mxu1 }
 0x62f   :  { %v1060_v38 = vadd.f32 %v1368_v36, %v1059_v37 }
 0x630   :  { %v1812_v39 = vpop.f32.mrf.mxu1 }
 0x631   :  { %v1063_v40 = vmax.f32 %v1060_v38, 0.0 }
 0x633   :  { %1830 = vmatmul.mubr.msk.f32.vlgmr.msra.gmra.mxu0 %vm330_vm2, %v1063_v40 }
 0x634   :  { %1855 = vmatprep.mubr.msk.f32.mxu0 %vm1929_vm0, %v1928_v0  ;;  %1852 = vmatpush3.msra.mxu0 %v1152_v62 }
 0x635   :  { %1853 = vmatprep.subr.mxu0 %v1928_v0 }
 0x636   :  { %1854 = vmatpush3.msra.mxu0 %v1151_v63 }
 0x671   :  { %v1320_v41 = vpop.xlane.xlu0 %1319 }
 0x672   :  { %v1321_v42 = vrot.slane %v1320_v41, 4 }
 0x674   :  { %v1322_v44 = vadd.f32 %v1321_v42, %v1320_v41 }
 0x676   :  { %v1323_v47 = vrot.slane %v1322_v44, 2 }
 0x678   :  { %v1324_v49 = vadd.f32 %v1323_v47, %v1322_v44 }
 0x67a   :  { %v1325_v51 = vrot.slane %v1324_v49, 1 }
 0x67c   :  { %v1326_v52 = vadd.f32 %v1325_v51, %v1324_v49 }
 0x67e   :  { %v1327_v53 = vmul.f32 0.125, %v1326_v52 }
 0x680   :  { %1329 = vst.msk [vmem:[#allocation5] sm:$0x1] %vm1328_vm6, %v1327_v53 }
 0x6f3   :  { %v1137_v56 = vpop.f32.mrf.mxu0 }
 0x6f4   :  { %v1138_v57 = vadd.f32 %v1369_v54, %v1137_v56 }
 0x6f5   :  { %v1831_v58 = vpop.f32.mrf.mxu0 }
 0x6f6   :  { %v1141_v59 = vmax.f32 %v1138_v57, 0.0 }
 0x6f8   :  { %v1142_v60 = vadd.f32 %v1141_v59, %v2139_v1 }
 0x6fa   :  { %1849 = vmatmul.mubr.msk.f32.vlgmr.msra.gmra.mxu1 %vm330_vm2, %v1142_v60 }
 0x7ba   :  { %v1228_v3 = vpop.f32.mrf.mxu1 }
 0x7bb   :  { %v1229_v4 = vadd.f32 %v1371_v2, %v1228_v3 }
 0x7bc   :  { %v1850_v5 = vpop.f32.mrf.mxu1 }
 0x7bd   :  { %v1232_v6 = vmax.f32 %v1229_v4, 0.0 }
 0x7bf   :  { %1856 = vmatmul.mubr.msk.f32.vlgmr.msra.gmra.mxu0 %vm1237_vm7, %v1232_v6 }
 0x7c0   :  { %1912 = shalt.err (!%p1909_p9)
}
 0x7c1   :  { %1341 = dma.vmem_to_hbm [thread:$0]  %s1339_s21, 16, %s2179_s3, [#allocation4]   ;;  %v1373_v0 = vld [vmem:[#allocation2 + $0x489] ss:$0 sm:$0xff] }
 0x87f   :  { %v1307_v1 = vpop.f32.mrf.mxu0 }
 0x880   :  { %v1308_v7 = vadd.f32 %v1373_v0, %v1307_v1 }
 0x881   :  { %v1857_v8 = vpop.f32.mrf.mxu0 }
 0x882   :  { %v1375_v10 = vmul.f32 -1.442695, %v1308_v7 }
 0x884   :  { %1877 = vpow2.f32 %v1375_v10 }
 0x891   :  { %v1878_v11 = vpop.eup %1877 }
 0x892   :  { %v1314_v12 = vadd.f32 1.0, %v1878_v11 }
 0x894   :  { %1879 = vrcp.f32 %v1314_v12 }
 0x8a1   :  { %v1880_v46 = vpop.eup %1879 }
 0x8a2   :  { %1317 = vst [vmem:[%s2178_s2] sm:$0xff] %v1880_v46 }
 0x8a3   :  { %1923 = dma.done.wait [#allocation4], 16  }
 0x8a4   :  { %1924 = vsyncadd [#allocation4], 4294967280 }
 0x8a5   :  { %1347 = vsyncpa [#allocation3], 1 }
 0x8a6   :  { %1348 = vsyncpa [#allocation4], 1 }

</bundles_post_ra>
